<compile_context>
chip_gen: v7x
topology: tpu7x:2x2x1
jax: 0.10.0
libtpu: 0.0.40
codegen_flags: <defaults>
</compile_context>

<pallas_src>
import jax
import jax.numpy as jnp
from jax import lax
from jax.experimental import pallas as pl
from jax.experimental.pallas import tpu as pltpu

EPS = 1e-5
LANES = 128
_STAT_ROWS = 8  # row 0 = per-channel sum, row 1 = per-channel sum of squares

_CPARAMS = pltpu.CompilerParams(
    dimension_semantics=("parallel",),
    vmem_limit_bytes=48 * 1024 * 1024,
)


# ----------------------------- Pallas kernels ------------------------------ #

def _partial_stats(y):
    """(8, C) block: row0 = sum over rows, row1 = sum of squares, rest 0."""
    s = jnp.sum(y, axis=0, keepdims=True)
    ss = jnp.sum(y * y, axis=0, keepdims=True)
    row = lax.broadcasted_iota(jnp.int32, (_STAT_ROWS, 1), 0)
    return jnp.where(row == 0, s, jnp.where(row == 1, ss, 0.0))


def _conv_stats_kernel(p_ref, w_ref, y_ref, s_ref):
    # conv as im2col matmul (bf16 MXU inputs, f32 accumulation) + per-tile
    # partial BN statistics.
    y = jnp.dot(p_ref[...], w_ref[...], preferred_element_type=jnp.float32)
    y_ref[...] = y.astype(y_ref.dtype)
    s_ref[...] = _partial_stats(y)


def _conv_dual_stats_kernel(p_ref, w_ref, ip_ref, wd_ref,
                            y_ref, yd_ref, s_ref, sd_ref):
    # conv1 + fused 1x1 downsample conv, each with partial BN stats.
    y = jnp.dot(p_ref[...], w_ref[...], preferred_element_type=jnp.float32)
    yd = jnp.dot(ip_ref[...], wd_ref[...], preferred_element_type=jnp.float32)
    y_ref[...] = y.astype(y_ref.dtype)
    yd_ref[...] = yd
    s_ref[...] = _partial_stats(y)
    sd_ref[...] = _partial_stats(yd)


def _bn_add_relu_ds_kernel(y2_ref, sc2_ref, bi2_ref, yd_ref, scd_ref, bid_ref,
                           o_ref):
    # bn2 apply + bn_d apply on the downsample branch + add + relu.
    main = y2_ref[...] * sc2_ref[...] + bi2_ref[...]
    ident = yd_ref[...] * scd_ref[...] + bid_ref[...]
    o_ref[...] = jnp.maximum(main + ident, 0.0)


def _bn_add_relu_id_kernel(y2_ref, sc2_ref, bi2_ref, id_ref, o_ref):
    # bn2 apply + identity add + relu.
    o_ref[...] = jnp.maximum(
        y2_ref[...] * sc2_ref[...] + bi2_ref[...] + id_ref[...], 0.0)


# ------------------------------ glue helpers ------------------------------- #

def _round_up(x, m):
    return (x + m - 1) // m * m


def _pick_epilogue_tile(mp, tm, target=2048):
    """Largest multiple of tm that divides mp and is <= target (mem-bound tile)."""
    best = tm
    t = tm
    while t <= min(mp, target):
        if mp % t == 0:
            best = t
        t += tm
    return best


def _im2col3x3(x_nhwc, stride):
    """im2col for a 3x3 conv, padding=1; columns ordered (kh, kw, c), c fastest."""
    N, H, W, C = x_nhwc.shape
    xp = jnp.pad(x_nhwc, ((0, 0), (1, 1), (1, 1), (0, 0)))
    Ho = (H - 1) // stride + 1
    Wo = (W - 1) // stride + 1
    cols = []
    for kh in range(3):
        for kw in range(3):
            sl = xp[:, kh:kh + (Ho - 1) * stride + 1:stride,
                       kw:kw + (Wo - 1) * stride + 1:stride, :]
            cols.append(sl)
    patches = jnp.concatenate(cols, axis=-1)          # (N, Ho, Wo, 9*C)
    return patches.reshape(N * Ho * Wo, 9 * C), Ho, Wo


def _w3x3_to_mat(w_oihw, cin_pad, cout_pad):
    # (O, I, 3, 3) -> (kh, kw, I, O), zero-pad I/O, flatten to (9*cin_pad, cout_pad)
    # so rows match the (kh, kw, c)-ordered (channel-padded) patch columns.
    w = jnp.transpose(w_oihw, (2, 3, 1, 0))
    w = jnp.pad(w, ((0, 0), (0, 0),
                    (0, cin_pad - w.shape[2]), (0, cout_pad - w.shape[3])))
    return w.reshape(9 * cin_pad, cout_pad)


def _bn_scale_bias(stats, count, gamma, beta, cp):
    """Reduce per-tile partial stats and fold BN into per-channel scale/bias."""
    st = stats.reshape(-1, _STAT_ROWS, cp)
    total = jnp.sum(st, axis=0)                        # (8, cp)
    mean = total[0] / count
    var = jnp.maximum(total[1] / count - mean * mean, 0.0)   # biased variance
    g = jnp.pad(gamma.astype(jnp.float32), (0, cp - gamma.shape[0]))
    b = jnp.pad(beta.astype(jnp.float32), (0, cp - beta.shape[0]))
    scale = g * lax.rsqrt(var + EPS)
    bias = b - mean * scale
    return scale.reshape(1, cp), bias.reshape(1, cp)


def _row_spec(tm, width):
    return pl.BlockSpec((tm, width), lambda i: (i, 0))


def _const_spec(shape):
    return pl.BlockSpec(shape, lambda i: (0, 0))


def _stats_spec(cp):
    return pl.BlockSpec((_STAT_ROWS, cp), lambda i: (i, 0))


# ------------------------------ forward pass ------------------------------- #

def basic_block_forward(x_nchw, params, stride, *, tile_m=256):
    x = jnp.transpose(x_nchw, (0, 2, 3, 1)).astype(jnp.float32)   # NCHW -> NHWC
    N, H, W, Cin = x.shape
    Cout = params["w1"].shape[0]
    Cp = _round_up(Cout, LANES)          # lane-dense output channels
    Cin_p = _round_up(Cin, 8)            # matmul K-dim alignment

    # zero-pad input channels once (used by conv1 patches and downsample branch)
    x_c = jnp.pad(x, ((0, 0), (0, 0), (0, 0), (0, Cin_p - Cin)))

    # conv1 patches in bf16 (halves the materialized im2col bytes)
    p1, Ho, Wo = _im2col3x3(x_c.astype(jnp.bfloat16), stride)     # (M, 9*Cin_p)
    M = N * Ho * Wo
    TM = tile_m
    Mp = _round_up(M, TM)                # pad rows: full-height MXU tiles always
    G = Mp // TM
    K1 = 9 * Cin_p
    p1 = jnp.pad(p1, ((0, Mp - M), (0, 0)))

    w1m = _w3x3_to_mat(params["w1"], Cin_p, Cp).astype(jnp.bfloat16)
    downsample = (stride != 1) or (Cin != Cout)

    # --- kernel 1: conv1 (+ fused 1x1 downsample conv) + partial BN stats ----
    if downsample:
        idp = x_c[:, ::stride, ::stride, :].astype(jnp.bfloat16).reshape(M, Cin_p)
        idp = jnp.pad(idp, ((0, Mp - M), (0, 0)))
        wdm = jnp.pad(params["wd"].reshape(Cout, Cin).T,
                      ((0, Cin_p - Cin), (0, Cp - Cout))).astype(jnp.bfloat16)
        y1, yd, s1, sd = pl.pallas_call(
            _conv_dual_stats_kernel,
            grid=(G,),
            in_specs=[_row_spec(TM, K1), _const_spec((K1, Cp)),
                      _row_spec(TM, Cin_p), _const_spec((Cin_p, Cp))],
            out_specs=[_row_spec(TM, Cp), _row_spec(TM, Cp),
                       _stats_spec(Cp), _stats_spec(Cp)],
            out_shape=[jax.ShapeDtypeStruct((Mp, Cp), jnp.bfloat16),
                       jax.ShapeDtypeStruct((Mp, Cp), jnp.float32),
                       jax.ShapeDtypeStruct((G * _STAT_ROWS, Cp), jnp.float32),
                       jax.ShapeDtypeStruct((G * _STAT_ROWS, Cp), jnp.float32)],
            compiler_params=_CPARAMS,
        )(p1, w1m, idp, wdm)
        scale_d, bias_d = _bn_scale_bias(sd, M, params["gd"], params["bd"], Cp)
    else:
        y1, s1 = pl.pallas_call(
            _conv_stats_kernel,
            grid=(G,),
            in_specs=[_row_spec(TM, K1), _const_spec((K1, Cp))],
            out_specs=[_row_spec(TM, Cp), _stats_spec(Cp)],
            out_shape=[jax.ShapeDtypeStruct((Mp, Cp), jnp.bfloat16),
                       jax.ShapeDtypeStruct((G * _STAT_ROWS, Cp), jnp.float32)],
            compiler_params=_CPARAMS,
        )(p1, w1m)

    scale1, bias1 = _bn_scale_bias(s1, M, params["g1"], params["b1"], Cp)

    # --- bn1-apply + relu, applied ONCE on y1 (f32), fused by XLA into the ----
    # --- p2 im2col producer; conv2's zero padding therefore stays exact. -----
    a1 = jnp.maximum(y1[:M].astype(jnp.float32) * scale1 + bias1, 0.0)
    a1 = a1.astype(jnp.bfloat16).reshape(N, Ho, Wo, Cp)

    # --- kernel 2: conv2 (plain conv + partial BN2 stats) ---------------------
    p2, _, _ = _im2col3x3(a1, 1)                      # (M, 9*Cp) bf16
    p2 = jnp.pad(p2, ((0, Mp - M), (0, 0)))
    K2 = 9 * Cp
    w2m = _w3x3_to_mat(params["w2"], Cp, Cp).astype(jnp.bfloat16)

    y2, s2 = pl.pallas_call(
        _conv_stats_kernel,
        grid=(G,),
        in_specs=[_row_spec(TM, K2), _const_spec((K2, Cp))],
        out_specs=[_row_spec(TM, Cp), _stats_spec(Cp)],
        out_shape=[jax.ShapeDtypeStruct((Mp, Cp), jnp.float32),
                   jax.ShapeDtypeStruct((G * _STAT_ROWS, Cp), jnp.float32)],
        compiler_params=_CPARAMS,
    )(p2, w2m)

    scale2, bias2 = _bn_scale_bias(s2, M, params["g2"], params["b2"], Cp)

    # --- kernel 3: bn2-apply + residual add + relu (mem-bound, big row tile) --
    TM3 = _pick_epilogue_tile(Mp, TM)
    G3 = Mp // TM3

    if downsample:
        out = pl.pallas_call(
            _bn_add_relu_ds_kernel,
            grid=(G3,),
            in_specs=[_row_spec(TM3, Cp), _const_spec((1, Cp)),
                      _const_spec((1, Cp)), _row_spec(TM3, Cp),
                      _const_spec((1, Cp)), _const_spec((1, Cp))],
            out_specs=_row_spec(TM3, Cp),
            out_shape=jax.ShapeDtypeStruct((Mp, Cp), jnp.float32),
            compiler_params=_CPARAMS,
        )(y2, scale2, bias2, yd, scale_d, bias_d)
    else:
        ident = jnp.pad(x.reshape(M, Cin), ((0, Mp - M), (0, Cp - Cin)))
        out = pl.pallas_call(
            _bn_add_relu_id_kernel,
            grid=(G3,),
            in_specs=[_row_spec(TM3, Cp), _const_spec((1, Cp)),
                      _const_spec((1, Cp)), _row_spec(TM3, Cp)],
            out_specs=_row_spec(TM3, Cp),
            out_shape=jax.ShapeDtypeStruct((Mp, Cp), jnp.float32),
            compiler_params=_CPARAMS,
        )(y2, scale2, bias2, ident)

    out = out[:M].reshape(N, Ho, Wo, Cp)[:, :, :, :Cout]
    return jnp.transpose(out, (0, 3, 1, 2))           # back to NCHW


# ------------------------- pure-JAX reference check ------------------------ #

def ref_basic_block(x, params, stride):
    def conv(z, w, s, p):
        return lax.conv_general_dilated(
            z, w, (s, s), ((p, p), (p, p)),
            dimension_numbers=("NCHW", "OIHW", "NCHW"))

    def bn(y, g, b):
        mu = jnp.mean(y, axis=(0, 2, 3), keepdims=True)
        var = jnp.mean(jnp.square(y - mu), axis=(0, 2, 3), keepdims=True)
        return ((y - mu) * lax.rsqrt(var + EPS) * g.reshape(1, -1, 1, 1)
                + b.reshape(1, -1, 1, 1))

    out = jax.nn.relu(bn(conv(x, params["w1"], stride, 1),
                         params["g1"], params["b1"]))
    out = bn(conv(out, params["w2"], 1, 1), params["g2"], params["b2"])
    if stride != 1 or params["w1"].shape[1] != params["w1"].shape[0]:
        ident = bn(conv(x, params["wd"], stride, 0), params["gd"], params["bd"])
    else:
        ident = x
    return jax.nn.relu(out + ident)


# ---------------------------------- main ----------------------------------- #

if __name__ == "__main__":
    def make_params(key, cin, cout, downsample):
        ks = jax.random.split(key, 9)
        p = {
            "w1": 0.2 * jax.random.normal(ks[0], (cout, cin, 3, 3), jnp.float32),
            "g1": 1.0 + 0.1 * jax.random.normal(ks[1], (cout,), jnp.float32),
            "b1": 0.1 * jax.random.normal(ks[2], (cout,), jnp.float32),
            "w2": 0.2 * jax.random.normal(ks[3], (cout, cout, 3, 3), jnp.float32),
            "g2": 1.0 + 0.1 * jax.random.normal(ks[4], (cout,), jnp.float32),
            "b2": 0.1 * jax.random.normal(ks[5], (cout,), jnp.float32),
        }
        if downsample:
            p["wd"] = 0.2 * jax.random.normal(ks[6], (cout, cin, 1, 1), jnp.float32)
            p["gd"] = 1.0 + 0.1 * jax.random.normal(ks[7], (cout,), jnp.float32)
            p["bd"] = 0.1 * jax.random.normal(ks[8], (cout,), jnp.float32)
        return p

    # tolerance is sized for bf16 MXU inputs vs. an all-f32 reference
    MAX_ERR, MEAN_ERR = 5e-2, 1e-2
    key = jax.random.PRNGKey(0)
    k1, k2, k3, k4 = jax.random.split(key, 4)

    # Case 1: stride-2 block with channel expansion (downsample branch; M=128
    # rows are zero-padded up to the 256-row tile -> exercises row padding).
    N, Cin, H, W, Cout, stride = 2, 4, 16, 16, 8, 2
    x = jax.random.normal(k1, (N, Cin, H, W), jnp.float32)
    params = make_params(k2, Cin, Cout, True)
    out = jax.block_until_ready(basic_block_forward(x, params, stride))
    ref = ref_basic_block(x, params, stride)
    assert out.shape == (N, Cout, H // stride, W // stride), out.shape
    err = float(jnp.max(jnp.abs(out - ref)))
    merr = float(jnp.mean(jnp.abs(out - ref)))
    assert err < MAX_ERR and merr < MEAN_ERR, (err, merr)

    # Case 2: stride-1 identity block (M=512 -> 2 matmul tiles; cross-tile BN
    # stats; epilogue picks a larger 512-row tile).
    N, Cin, H, W, Cout, stride = 2, 8, 16, 16, 8, 1
    x = jax.random.normal(k3, (N, Cin, H, W), jnp.float32)
    params = make_params(k4, Cin, Cout, False)
    out = jax.block_until_ready(basic_block_forward(x, params, stride))
    ref = ref_basic_block(x, params, stride)
    assert out.shape == (N, Cout, H, W), out.shape
    err = float(jnp.max(jnp.abs(out - ref)))
    merr = float(jnp.mean(jnp.abs(out - ref)))
    assert err < MAX_ERR and merr < MEAN_ERR, (err, merr)

    print("KERNEL_OK")
</pallas_src>

<mosaic_0001>
module attributes {stable_mosaic.version = 11 : i64} {
  func.func @_conv_dual_stats_kernel(%arg0: i32, %arg1: memref<256x72xbf16, #tpu.memory_space<vmem>>, %arg2: memref<72x128xbf16, #tpu.memory_space<vmem>>, %arg3: memref<256x8xbf16, #tpu.memory_space<vmem>>, %arg4: memref<8x128xbf16, #tpu.memory_space<vmem>>, %arg5: memref<256x128xbf16, #tpu.memory_space<vmem>>, %arg6: memref<256x128xf32, #tpu.memory_space<vmem>>, %arg7: memref<8x128xf32, #tpu.memory_space<vmem>>, %arg8: memref<8x128xf32, #tpu.memory_space<vmem>>) attributes {dimension_semantics = [#tpu.dimension_semantics<parallel>], iteration_bounds = array<i64: 1>, scalar_prefetch = 0 : i64, scratch_operands = 0 : i64, tpu.core_type = #tpu.core_type<tc>, window_params = [{transform_indices = @transform_0, window_bounds = array<i64: 256, 72>}, {pipeline_mode = #tpu.pipeline_mode<synchronous>, transform_indices = @transform_1, window_bounds = array<i64: 72, 128>}, {transform_indices = @transform_2, window_bounds = array<i64: 256, 8>}, {pipeline_mode = #tpu.pipeline_mode<synchronous>, transform_indices = @transform_3, window_bounds = array<i64: 8, 128>}, {transform_indices = @transform_4, window_bounds = array<i64: 256, 128>}, {transform_indices = @transform_5, window_bounds = array<i64: 256, 128>}, {transform_indices = @transform_6, window_bounds = array<i64: 8, 128>}, {transform_indices = @transform_7, window_bounds = array<i64: 8, 128>}]} {
    %c0 = arith.constant 0 : index
    %c0_0 = arith.constant 0 : index
    %0 = vector.load %arg1[%c0, %c0_0] : memref<256x72xbf16, #tpu.memory_space<vmem>>, vector<256x72xbf16>
    %c0_1 = arith.constant 0 : index
    %c0_2 = arith.constant 0 : index
    %1 = vector.load %arg2[%c0_1, %c0_2] : memref<72x128xbf16, #tpu.memory_space<vmem>>, vector<72x128xbf16>
    %cst = arith.constant dense<0.000000e+00> : vector<256x128xf32>
    %2 = tpu.matmul %0, %1, %cst {dimension_numbers = #tpu.dot_dimension_numbers<[1], [0], [0], [1], [0, 0, 1, 1], [], []>} : vector<256x72xbf16>, vector<72x128xbf16>, vector<256x128xf32> -> vector<256x128xf32>
    %c0_3 = arith.constant 0 : index
    %c0_4 = arith.constant 0 : index
    %3 = vector.load %arg3[%c0_3, %c0_4] : memref<256x8xbf16, #tpu.memory_space<vmem>>, vector<256x8xbf16>
    %c0_5 = arith.constant 0 : index
    %c0_6 = arith.constant 0 : index
    %4 = vector.load %arg4[%c0_5, %c0_6] : memref<8x128xbf16, #tpu.memory_space<vmem>>, vector<8x128xbf16>
    %cst_7 = arith.constant dense<0.000000e+00> : vector<256x128xf32>
    %5 = tpu.matmul %3, %4, %cst_7 {dimension_numbers = #tpu.dot_dimension_numbers<[1], [0], [0], [1], [0, 0, 1, 1], [], []>} : vector<256x8xbf16>, vector<8x128xbf16>, vector<256x128xf32> -> vector<256x128xf32>
    %6 = arith.truncf %2 : vector<256x128xf32> to vector<256x128xbf16>
    %c0_8 = arith.constant 0 : index
    %c0_9 = arith.constant 0 : index
    %7 = vector.load %arg5[%c0_8, %c0_9] : memref<256x128xbf16, #tpu.memory_space<vmem>>, vector<256x128xbf16>
    tpu.vector_store %arg5[%c0_8, %c0_9], %6 {strides = array<i32>} : memref<256x128xbf16, #tpu.memory_space<vmem>>, vector<256x128xbf16>,
    %c0_10 = arith.constant 0 : index
    %c0_11 = arith.constant 0 : index
    %8 = vector.load %arg6[%c0_10, %c0_11] : memref<256x128xf32, #tpu.memory_space<vmem>>, vector<256x128xf32>
    tpu.vector_store %arg6[%c0_10, %c0_11], %5 {strides = array<i32>} : memref<256x128xf32, #tpu.memory_space<vmem>>, vector<256x128xf32>,
    %cst_12 = arith.constant dense<0.000000e+00> : vector<128xf32>
    %9 = vector.multi_reduction <add>, %2, %cst_12 [0] : vector<256x128xf32> to vector<128xf32>
    %10 = vector.shape_cast %9 : vector<128xf32> to vector<1x128xf32>
    %11 = arith.mulf %2, %2 : vector<256x128xf32>
    %cst_13 = arith.constant dense<0.000000e+00> : vector<128xf32>
    %12 = vector.multi_reduction <add>, %11, %cst_13 [0] : vector<256x128xf32> to vector<128xf32>
    %13 = vector.shape_cast %12 : vector<128xf32> to vector<1x128xf32>
    %14 = tpu.iota {dimensions = array<i32: 0>} : vector<8x1xi32>
    %c0_i32 = arith.constant 0 : i32
    %15 = vector.broadcast %c0_i32 : i32 to vector<8x1xi32>
    %16 = arith.cmpi eq, %14, %15 : vector<8x1xi32>
    %c1_i32 = arith.constant 1 : i32
    %17 = vector.broadcast %c1_i32 : i32 to vector<8x1xi32>
    %18 = arith.cmpi eq, %14, %17 : vector<8x1xi32>
    %cst_14 = arith.constant 0.000000e+00 : f32
    %19 = vector.shape_cast %18 : vector<8x1xi1> to vector<8x1xi1>
    %20 = vector.broadcast %19 : vector<8x1xi1> to vector<8x128xi1>
    %21 = vector.shape_cast %13 : vector<1x128xf32> to vector<1x128xf32>
    %22 = vector.broadcast %21 : vector<1x128xf32> to vector<8x128xf32>
    %23 = vector.broadcast %cst_14 : f32 to vector<8x128xf32>
    %24 = arith.select %20, %22, %23 : vector<8x128xi1>, vector<8x128xf32>
    %25 = vector.shape_cast %16 : vector<8x1xi1> to vector<8x1xi1>
    %26 = vector.broadcast %25 : vector<8x1xi1> to vector<8x128xi1>
    %27 = vector.shape_cast %10 : vector<1x128xf32> to vector<1x128xf32>
    %28 = vector.broadcast %27 : vector<1x128xf32> to vector<8x128xf32>
    %29 = arith.select %26, %28, %24 : vector<8x128xi1>, vector<8x128xf32>
    %c0_15 = arith.constant 0 : index
    %c0_16 = arith.constant 0 : index
    %30 = vector.load %arg7[%c0_15, %c0_16] : memref<8x128xf32, #tpu.memory_space<vmem>>, vector<8x128xf32>
    tpu.vector_store %arg7[%c0_15, %c0_16], %29 {strides = array<i32>} : memref<8x128xf32, #tpu.memory_space<vmem>>, vector<8x128xf32>,
    %cst_17 = arith.constant dense<0.000000e+00> : vector<128xf32>
    %31 = vector.multi_reduction <add>, %5, %cst_17 [0] : vector<256x128xf32> to vector<128xf32>
    %32 = vector.shape_cast %31 : vector<128xf32> to vector<1x128xf32>
    %33 = arith.mulf %5, %5 : vector<256x128xf32>
    %cst_18 = arith.constant dense<0.000000e+00> : vector<128xf32>
    %34 = vector.multi_reduction <add>, %33, %cst_18 [0] : vector<256x128xf32> to vector<128xf32>
    %35 = vector.shape_cast %34 : vector<128xf32> to vector<1x128xf32>
    %36 = tpu.iota {dimensions = array<i32: 0>} : vector<8x1xi32>
    %c0_i32_19 = arith.constant 0 : i32
    %37 = vector.broadcast %c0_i32_19 : i32 to vector<8x1xi32>
    %38 = arith.cmpi eq, %36, %37 : vector<8x1xi32>
    %c1_i32_20 = arith.constant 1 : i32
    %39 = vector.broadcast %c1_i32_20 : i32 to vector<8x1xi32>
    %40 = arith.cmpi eq, %36, %39 : vector<8x1xi32>
    %cst_21 = arith.constant 0.000000e+00 : f32
    %41 = vector.shape_cast %40 : vector<8x1xi1> to vector<8x1xi1>
    %42 = vector.broadcast %41 : vector<8x1xi1> to vector<8x128xi1>
    %43 = vector.shape_cast %35 : vector<1x128xf32> to vector<1x128xf32>
    %44 = vector.broadcast %43 : vector<1x128xf32> to vector<8x128xf32>
    %45 = vector.broadcast %cst_21 : f32 to vector<8x128xf32>
    %46 = arith.select %42, %44, %45 : vector<8x128xi1>, vector<8x128xf32>
    %47 = vector.shape_cast %38 : vector<8x1xi1> to vector<8x1xi1>
    %48 = vector.broadcast %47 : vector<8x1xi1> to vector<8x128xi1>
    %49 = vector.shape_cast %32 : vector<1x128xf32> to vector<1x128xf32>
    %50 = vector.broadcast %49 : vector<1x128xf32> to vector<8x128xf32>
    %51 = arith.select %48, %50, %46 : vector<8x128xi1>, vector<8x128xf32>
    %c0_22 = arith.constant 0 : index
    %c0_23 = arith.constant 0 : index
    %52 = vector.load %arg8[%c0_22, %c0_23] : memref<8x128xf32, #tpu.memory_space<vmem>>, vector<8x128xf32>
    tpu.vector_store %arg8[%c0_22, %c0_23], %51 {strides = array<i32>} : memref<8x128xf32, #tpu.memory_space<vmem>>, vector<8x128xf32>,
    return
  }
  func.func @transform_0(%arg0: i32) -> (i32, i32) {
    %c0_i32 = arith.constant 0 : i32
    %c0_i32_0 = arith.constant 0 : i32
    return %arg0, %c0_i32 : i32, i32
  }
  func.func @transform_1(%arg0: i32) -> (i32, i32) {
    %c0_i32 = arith.constant 0 : i32
    %c0_i32_0 = arith.constant 0 : i32
    %c0_i32_1 = arith.constant 0 : i32
    return %c0_i32, %c0_i32_0 : i32, i32
  }
  func.func @transform_2(%arg0: i32) -> (i32, i32) {
    %c0_i32 = arith.constant 0 : i32
    %c0_i32_0 = arith.constant 0 : i32
    return %arg0, %c0_i32 : i32, i32
  }
  func.func @transform_3(%arg0: i32) -> (i32, i32) {
    %c0_i32 = arith.constant 0 : i32
    %c0_i32_0 = arith.constant 0 : i32
    %c0_i32_1 = arith.constant 0 : i32
    return %c0_i32, %c0_i32_0 : i32, i32
  }
  func.func @transform_4(%arg0: i32) -> (i32, i32) {
    %c0_i32 = arith.constant 0 : i32
    %c0_i32_0 = arith.constant 0 : i32
    return %arg0, %c0_i32 : i32, i32
  }
  func.func @transform_5(%arg0: i32) -> (i32, i32) {
    %c0_i32 = arith.constant 0 : i32
    %c0_i32_0 = arith.constant 0 : i32
    return %arg0, %c0_i32 : i32, i32
  }
  func.func @transform_6(%arg0: i32) -> (i32, i32) {
    %c0_i32 = arith.constant 0 : i32
    %c0_i32_0 = arith.constant 0 : i32
    return %arg0, %c0_i32 : i32, i32
  }
  func.func @transform_7(%arg0: i32) -> (i32, i32) {
    %c0_i32 = arith.constant 0 : i32
    %c0_i32_0 = arith.constant 0 : i32
    return %arg0, %c0_i32 : i32, i32
  }
}

</mosaic_0001>

<bundles_post_ra>
// kernel: tpu_custom_call.1
= control target key start
LH: loop header
LB: loop body
LE: loop exit
PB: predicated region body
PF: predicated region fallthrough
CT: control target
= control target key end

     0   :  { %13 = vsyncpa [#allocation3], 0  ;;  %s1945_s0 = inlined_call_operand.vmem [shape: bf16[256,72], index: 0, kind: input, shape index: {}]   ;;  %s1946_s1 = inlined_call_operand.vmem [shape: bf16[72,128], index: 1, kind: input, shape index: {}]   ;;  %s1947_s2 = inlined_call_operand.vmem [shape: bf16[256,8], index: 2, kind: input, shape index: {}]   ;;  %s1948_s3 = inlined_call_operand.vmem [shape: bf16[8,128], index: 3, kind: input, shape index: {}]   ;;  %s1949_s4 = inlined_call_operand.hbm [shape: bf16[256,128], index: 4, kind: output, shape index: {0}]   ;;  %s1950_s5 = inlined_call_operand.hbm [shape: f32[256,128], index: 5, kind: output, shape index: {1}]   ;;  %s1951_s6 = inlined_call_operand.hbm [shape: f32[8,128], index: 6, kind: output, shape index: {2}]   ;;  %s1952_s7 = inlined_call_operand.hbm [shape: f32[8,128], index: 7, kind: output, shape index: {3}]  }
   0x1   :  { %14 = vsyncpa [#allocation5], 0  ;;  %v1542_v0 = vld [vmem:[%s1946_s1] sm:$0xff]   ;;  %vm222_vm0 = vcmask 1043456   ;;  %vm500_vm1 = vcmask 64512   ;;  %v1544_v4 = vld [vmem:[%s1946_s1 + $0x8] sm:$0xff]  }
   0x2   :  { %v419_v1 = vld [vmem:[%s1948_s3] sm:$0xf]  ;;  %1456 = vmatprep.subr.bf16.mxu0 %v1542_v0  ;;  %v1545_v5 = vld [vmem:[%s1947_s2 + $0x8] sm:$0xff]   ;;  %v1546_v6 = vld [vmem:[%s1946_s1 + $0x10] sm:$0xff]   ;;  %vm173_vm2 = vcmask 588800  }
   0x3   :  { %1533 = vmatprep.subr.msk.bf16.mxu1 %vm222_vm0, %v419_v1  ;;  %v550_v2 = vsel %vm222_vm0, %v419_v1, 0  ;;  %v1543_v3 = vld [vmem:[%s1947_s2] sm:$0xff]   ;;  %1457 = vmatpush3.bf16.msra.mxu0 %v1542_v0  ;;  %v1547_v7 = vld [vmem:[%s1947_s2 + $0x10] sm:$0xff]   ;;  %v1548_v8 = vld [vmem:[%s1946_s1 + $0x18] sm:$0xff]  }
   0x4   :  { %1499 = vmatpush3.bf16.msra.mxu1 %v550_v2  ;;  %1500 = vmatprep.mubr.msk.bf16.mxu1 %vm500_vm1, %v1543_v3  ;;  %v1551_v9 = vld [vmem:[%s1945_s0] sm:$0xff]   ;;  %v1549_v10 = vld [vmem:[%s1947_s2 + $0x18] sm:$0xff]   ;;  %v1553_v14 = vld [vmem:[%s1945_s0 + $0x8] sm:$0xff]  }
   0x5   :  { %1458 = vmatprep.subr.bf16.mxu0 %v1544_v4  ;;  %1466 = vmatprep.mubr.msk.bf16.mxu0 %vm173_vm2, %v1551_v9  ;;  %v1552_v11 = vld [vmem:[%s1947_s2 + $0x20] sm:$0xff]   ;;  %v1554_v15 = vld [vmem:[%s1947_s2 + $0x28] sm:$0xff]   ;;  %v1555_v16 = vld [vmem:[%s1945_s0 + $0x10] sm:$0xff]  }
   0x6   :  { %v1550_v12 = vld [vmem:[%s1946_s1 + $0x20] ss:$0 sps:$4 sm:$0xff]   ;;  %v1556_v17 = vld [vmem:[%s1947_s2 + $0x30] sm:$0xff]   ;;  %v1557_v18 = vld [vmem:[%s1945_s0 + $0x18] sm:$0xff]  }
   0x7   :  { %1501 = vmatmul.mubr.msk.bf16.vlgmr.msra.gmra.mrb[0].mxu1 %vm500_vm1, %v1545_v5  ;;  %1459 = vmatpush3.bf16.msra.mxu0 %v1544_v4  ;;  %v224_v13 = vsel %vm222_vm0, %v1550_v12, 0  ;;  %v1558_v19 = vld [vmem:[%s1947_s2 + $0x38] sm:$0xff]   ;;  %v1559_v20 = vld [vmem:[%s1945_s0 + $0x20] sm:$0xff]   ;;  %v1561_v22 = vld [vmem:[%s1945_s0 + $0x28] sm:$0xff]  }
   0x8   :  { %1460 = vmatprep.subr.bf16.mxu0 %v1546_v6  ;;  %1504 = vmatprep.mubr.msk.bf16.mxu1 %vm500_vm1, %v1547_v7  ;;  %v1560_v21 = vld [vmem:[%s1947_s2 + $0x40] sm:$0xff]   ;;  %v1562_v23 = vld [vmem:[%s1947_s2 + $0x48] sm:$0xff]   ;;  %v1563_v24 = vld [vmem:[%s1945_s0 + $0x30] sm:$0xff]  }
   0x9   :  { %v1564_v25 = vld [vmem:[%s1947_s2 + $0x50] sm:$0xff]  }
   0xb   :  { %1461 = vmatpush3.bf16.msra.mxu0 %v1546_v6 }
   0xc   :  { %1462 = vmatprep.subr.bf16.mxu0 %v1548_v8 }
   0xf   :  { %1505 = vmatmul.mubr.msk.bf16.gmra.mrb[4].mxu1 %vm500_vm1, %v1549_v10  ;;  %1463 = vmatpush3.bf16.msra.mxu0 %v1548_v8 }
  0x10   :  { %1508 = vmatprep.mubr.msk.bf16.mxu1 %vm500_vm1, %v1552_v11  ;;  %1532 = vmatprep.subr.msk.bf16.mxu0 %vm222_vm0, %v1550_v12 }
  0x13   :  { %1465 = vmatpush3.bf16.msra.mxu0 %v224_v13 }
  0x16   :  { %1467 = vmatmul.mubr.msk.bf16.vlgmr.msra.gmra.mrb[0].mxu0 %vm173_vm2, %v1553_v14 }
  0x17   :  { %1509 = vmatmul.mubr.msk.bf16.gmra.mrb[8].mxu1 %vm500_vm1, %v1554_v15  ;;  %1470 = vmatprep.mubr.msk.bf16.mxu0 %vm173_vm2, %v1555_v16 }
  0x18   :  { %1512 = vmatprep.mubr.msk.bf16.mxu1 %vm500_vm1, %v1556_v17 }
  0x1e   :  { %1471 = vmatmul.mubr.msk.bf16.gmra.mrb[4].mxu0 %vm173_vm2, %v1557_v18 }
  0x1f   :  { %1513 = vmatmul.mubr.msk.bf16.gmra.mrb[12].mxu1 %vm500_vm1, %v1558_v19  ;;  %1474 = vmatprep.mubr.msk.bf16.mxu0 %vm173_vm2, %v1559_v20 }
  0x20   :  { %1516 = vmatprep.mubr.msk.bf16.mxu1 %vm500_vm1, %v1560_v21 }
  0x21   :  { %15 = vsyncpa [#allocation8], 0  ;;  %v1565_v26 = vld [vmem:[%s1945_s0 + $0x38] sm:$0xff]   ;;  %v1567_v28 = vld [vmem:[%s1945_s0 + $0x40] sm:$0xff]  }
  0x22   :  { %v1566_v27 = vld [vmem:[%s1947_s2 + $0x58] sm:$0xff]   ;;  %v1568_v29 = vld [vmem:[%s1947_s2 + $0x60] sm:$0xff]   ;;  %v1569_v30 = vld [vmem:[%s1945_s0 + $0x48] sm:$0xff]  }
  0x23   :  { %v1570_v31 = vld [vmem:[%s1947_s2 + $0x68] sm:$0xff]   ;;  %v1571_v32 = vld [vmem:[%s1945_s0 + $0x50] sm:$0xff]   ;;  %v1573_v34 = vld [vmem:[%s1945_s0 + $0x58] sm:$0xff]  }
  0x24   :  { %v1572_v33 = vld [vmem:[%s1947_s2 + $0x70] sm:$0xff]   ;;  %v1574_v35 = vld [vmem:[%s1947_s2 + $0x78] sm:$0xff]   ;;  %v1575_v36 = vld [vmem:[%s1945_s0 + $0x60] sm:$0xff]  }
  0x25   :  { %v1576_v37 = vld [vmem:[%s1945_s0 + $0x68] sm:$0xff]   ;;  %v1577_v38 = vld [vmem:[%s1945_s0 + $0x70] sm:$0xff]   ;;  %v1578_v39 = vld [vmem:[%s1945_s0 + $0x78] sm:$0xff]   ;;  %s1673_s0 = smov [#allocation4]  }
  0x26   :  { %1475 = vmatmul.mubr.msk.bf16.gmra.mrb[8].mxu0 %vm173_vm2, %v1561_v22  ;;  %s1148_s25 = sshll.u32 %s1673_s0, 4  ;;  %s1871_s25 = int_to_ptr.vmem [resolvable:$true] %s1148_s25 }
  0x27   :  { %1517 = vmatmul.mubr.msk.bf16.gmra.mrb[16].mxu1 %vm500_vm1, %v1562_v23  ;;  %1478 = vmatprep.mubr.msk.bf16.mxu0 %vm173_vm2, %v1563_v24  ;;  %s1579_s26 = scalar_lea.vmem %s1871_s25, 4096  ;;  %p1584_p1 = scmp.lt.s32.totalorder %s1871_s25, %s1871_s25 }
  0x28   :  { %1520 = vmatprep.mubr.msk.bf16.mxu1 %vm500_vm1, %v1564_v25  ;;  %p1580_p0 = scmp.ne.s32.totalorder %s1871_s25, %s1579_s26  ;;  %p1585_p2 = scmp.lt.s32.totalorder %s1579_s26, %s1579_s26 }
  0x2a   :  { %p1586_p3 = por %p1585_p2, %p1584_p1 }
  0x2c   :  { %p1587_p4 = pnand %p1586_p3, %p1580_p0 }
  0x2e   :  { %1479 = vmatmul.mubr.msk.bf16.gmra.mrb[12].mxu0 %vm173_vm2, %v1565_v26 }
  0x2f   :  { %1521 = vmatmul.mubr.msk.bf16.gmra.mrb[20].mxu1 %vm500_vm1, %v1566_v27  ;;  %1482 = vmatprep.mubr.msk.bf16.mxu0 %vm173_vm2, %v1567_v28 }
  0x30   :  { %1524 = vmatprep.mubr.msk.bf16.mxu1 %vm500_vm1, %v1568_v29 }
  0x36   :  { %1483 = vmatmul.mubr.msk.bf16.gmra.mrb[16].mxu0 %vm173_vm2, %v1569_v30 }
  0x37   :  { %1525 = vmatmul.mubr.msk.bf16.gmra.mrb[24].mxu1 %vm500_vm1, %v1570_v31  ;;  %1486 = vmatprep.mubr.msk.bf16.mxu0 %vm173_vm2, %v1571_v32 }
  0x38   :  { %1528 = vmatprep.mubr.msk.bf16.mxu1 %vm500_vm1, %v1572_v33 }
  0x3e   :  { %1487 = vmatmul.mubr.msk.bf16.gmra.mrb[20].mxu0 %vm173_vm2, %v1573_v34 }
  0x3f   :  { %1529 = vmatmul.mubr.msk.bf16.gmra.mrb[28].mxu1 %vm500_vm1, %v1574_v35  ;;  %1490 = vmatprep.mubr.msk.bf16.mxu0 %vm173_vm2, %v1575_v36 }
  0x46   :  { %1491 = vmatmul.mubr.msk.bf16.gmra.mrb[24].mxu0 %vm173_vm2, %v1576_v37 }
  0x47   :  { %1494 = vmatprep.mubr.msk.bf16.mxu0 %vm173_vm2, %v1577_v38 }
  0x4e   :  { %1495 = vmatmul.mubr.msk.bf16.gmra.mrb[28].mxu0 %vm173_vm2, %v1578_v39 }
  0xda   :  { %v1502_v40 = vpop.f32.mrb[0].mxu1 }
  0xdb   :  { %875 = vst [vmem:[#allocation4 + $0x10] sm:$0xff] %v1502_v40  ;;  %v586_v41 = vpop.f32.mrb[1].mxu1  ;;  %v1061_v45 = vmul.f32 %v1502_v40, %v1502_v40 }
  0xdc   :  { %873 = vst [vmem:[#allocation4] sm:$0xff] %v586_v41  ;;  %v1059_v42 = vmul.f32 %v586_v41, %v586_v41  ;;  %v1503_v43 = vpop.f32.mrb[2].mxu1 }
  0xdd   :  { %876 = vst [vmem:[#allocation4 + $0x18] sm:$0xff] %v1503_v43  ;;  %v589_v44 = vpop.f32.mrb[3].mxu1  ;;  %v1062_v48 = vmul.f32 %v1503_v43, %v1503_v43 }
  0xde   :  { %874 = vst [vmem:[#allocation4 + $0x8] sm:$0xff] %v589_v44  ;;  %v1022_v46 = vadd.f32 %v589_v44, %v586_v41  ;;  %v1060_v47 = vmul.f32 %v589_v44, %v589_v44 }
  0xe0   :  { %v1023_v49 = vadd.f32 %v1502_v40, %v1022_v46  ;;  %v1091_v50 = vadd.f32 %v1060_v47, %v1059_v42 }
  0xe2   :  { %v1092_v51 = vadd.f32 %v1091_v50, %v1061_v45  ;;  %v1506_v52 = vpop.f32.mrb[4].mxu1  ;;  %v1024_v53 = vadd.f32 %v1503_v43, %v1023_v49 }
  0xe3   :  { %879 = vst [vmem:[#allocation4 + $0x30] sm:$0xff] %v1506_v52  ;;  %v602_v54 = vpop.f32.mrb[5].mxu1  ;;  %v1065_v60 = vmul.f32 %v1506_v52, %v1506_v52 }
  0xe4   :  { %877 = vst [vmem:[#allocation4 + $0x20] sm:$0xff] %v602_v54  ;;  %v1025_v55 = vadd.f32 %v1024_v53, %v602_v54  ;;  %v1063_v56 = vmul.f32 %v602_v54, %v602_v54  ;;  %v1093_v57 = vadd.f32 %v1092_v51, %v1062_v48  ;;  %v1507_v58 = vpop.f32.mrb[6].mxu1 }
  0xe5   :  { %880 = vst [vmem:[#allocation4 + $0x38] sm:$0xff] %v1507_v58  ;;  %v605_v59 = vpop.f32.mrb[7].mxu1  ;;  %v1066_v0 = vmul.f32 %v1507_v58, %v1507_v58 }
  0xe6   :  { %v1094_v61 = vadd.f32 %v1093_v57, %v1063_v56  ;;  %878 = vst [vmem:[#allocation4 + $0x28] sm:$0xff] %v605_v59  ;;  %v1026_v62 = vadd.f32 %v1025_v55, %v605_v59  ;;  %v1064_v63 = vmul.f32 %v605_v59, %v605_v59 }
  0xe8   :  { %v1027_v1 = vadd.f32 %v1506_v52, %v1026_v62  ;;  %v1095_v2 = vadd.f32 %v1094_v61, %v1064_v63 }
  0xe9   :  { %v1468_v4 = vpop.f32.mrb[0].mxu0 }
  0xea   :  { %v1096_v3 = vadd.f32 %v1095_v2, %v1065_v60  ;;  %v1510_v5 = vpop.f32.mrb[8].mxu1  ;;  %v1028_v6 = vadd.f32 %v1507_v58, %v1027_v1  ;;  %v260_v7 = vpop.f32.mrb[1].mxu0  ;;  %v944_v25 = vmul.f32 %v1468_v4, %v1468_v4 }
  0xeb   :  { %883 = vst [vmem:[#allocation4 + $0x50] sm:$0xff] %v1510_v5  ;;  %v618_v8 = vpop.f32.mrb[9].mxu1  ;;  %v1469_v12 = vpop.f32.mrb[2].mxu0  ;;  %v942_v14 = vmul.f32 %v260_v7, %v260_v7  ;;  %v1069_v22 = vmul.f32 %v1510_v5, %v1510_v5 }
  0xec   :  { %881 = vst [vmem:[#allocation4 + $0x40] sm:$0xff] %v618_v8  ;;  %v1029_v9 = vadd.f32 %v1028_v6, %v618_v8  ;;  %v1067_v10 = vmul.f32 %v618_v8, %v618_v8  ;;  %v1097_v11 = vadd.f32 %v1096_v3, %v1066_v0  ;;  %v1511_v13 = vpop.f32.mrb[10].mxu1  ;;  %v1331_v15 = vpack.c.bf16 %v1469_v12, %v1468_v4  ;;  %v263_v16 = vpop.f32.mrb[3].mxu0 }
  0xed   :  { %884 = vst [vmem:[#allocation4 + $0x58] sm:$0xff] %v1511_v13  ;;  %v621_v17 = vpop.f32.mrb[11].mxu1  ;;  %v1326_v19 = vpack.c.bf16 %v263_v16, %v260_v7  ;;  %v905_v20 = vadd.f32 %v263_v16, %v260_v7  ;;  %v943_v21 = vmul.f32 %v263_v16, %v263_v16  ;;  %v1070_v28 = vmul.f32 %v1511_v13, %v1511_v13 }
  0xee   :  { %v1098_v18 = vadd.f32 %v1097_v11, %v1067_v10  ;;  %882 = vst [vmem:[#allocation4 + $0x48] sm:$0xff] %v621_v17  ;;  %1403 = vst [vmem:[#allocation2 + $0x8] sm:$0xff] %v1331_v15   ;;  %v1030_v23 = vadd.f32 %v1029_v9, %v621_v17  ;;  %v1068_v24 = vmul.f32 %v621_v17, %v621_v17 }
  0xef   :  { %1327 = vst [vmem:[#allocation2] sm:$0xff] %v1326_v19   ;;  %v906_v26 = vadd.f32 %v1468_v4, %v905_v20  ;;  %v974_v27 = vadd.f32 %v943_v21, %v942_v14  ;;  %v945_v31 = vmul.f32 %v1469_v12, %v1469_v12 }
  0xf0   :  { %v1031_v29 = vadd.f32 %v1510_v5, %v1030_v23  ;;  %v1099_v30 = vadd.f32 %v1098_v18, %v1068_v24 }
  0xf1   :  { %v975_v32 = vadd.f32 %v974_v27, %v944_v25  ;;  %v1472_v33 = vpop.f32.mrb[4].mxu0  ;;  %v907_v35 = vadd.f32 %v1469_v12, %v906_v26 }
  0xf2   :  { %v1514_v34 = vpop.f32.mrb[12].mxu1  ;;  %v1100_v36 = vadd.f32 %v1099_v30, %v1069_v22  ;;  %v276_v37 = vpop.f32.mrb[5].mxu0  ;;  %v1032_v39 = vadd.f32 %v1511_v13, %v1031_v29  ;;  %v948_v59 = vmul.f32 %v1472_v33, %v1472_v33 }
  0xf3   :  { %887 = vst [vmem:[#allocation4 + $0x70] sm:$0xff] %v1514_v34  ;;  %v634_v38 = vpop.f32.mrb[13].mxu1  ;;  %v908_v40 = vadd.f32 %v907_v35, %v276_v37  ;;  %v946_v41 = vmul.f32 %v276_v37, %v276_v37  ;;  %v976_v42 = vadd.f32 %v975_v32, %v945_v31  ;;  %v1473_v44 = vpop.f32.mrb[6].mxu0  ;;  %v1073_v51 = vmul.f32 %v1514_v34, %v1514_v34 }
  0xf4   :  { %885 = vst [vmem:[#allocation4 + $0x60] sm:$0xff] %v634_v38  ;;  %v1071_v43 = vmul.f32 %v634_v38, %v634_v38  ;;  %v1515_v45 = vpop.f32.mrb[14].mxu1  ;;  %v1033_v46 = vadd.f32 %v1032_v39, %v634_v38  ;;  %v1101_v47 = vadd.f32 %v1100_v36, %v1070_v28  ;;  %v1341_v48 = vpack.c.bf16 %v1473_v44, %v1472_v33  ;;  %v279_v49 = vpop.f32.mrb[7].mxu0 }
  0xf5   :  { %888 = vst [vmem:[#allocation4 + $0x78] sm:$0xff] %v1515_v45  ;;  %v637_v50 = vpop.f32.mrb[15].mxu1  ;;  %v977_v52 = vadd.f32 %v976_v42, %v946_v41  ;;  %v1336_v53 = vpack.c.bf16 %v279_v49, %v276_v37  ;;  %v909_v54 = vadd.f32 %v908_v40, %v279_v49  ;;  %v947_v56 = vmul.f32 %v279_v49, %v279_v49 }
  0xf6   :  { %886 = vst [vmem:[#allocation4 + $0x68] sm:$0xff] %v637_v50  ;;  %v1102_v55 = vadd.f32 %v1101_v47, %v1071_v43  ;;  %1405 = vst [vmem:[#allocation2 + $0x18] sm:$0xff] %v1341_v48   ;;  %v1034_v57 = vadd.f32 %v1033_v46, %v637_v50  ;;  %v1072_v58 = vmul.f32 %v637_v50, %v637_v50 }
  0xf7   :  { %1404 = vst [vmem:[#allocation2 + $0x10] sm:$0xff] %v1336_v53   ;;  %v910_v60 = vadd.f32 %v1472_v33, %v909_v54  ;;  %v1074_v61 = vmul.f32 %v1515_v45, %v1515_v45  ;;  %v978_v62 = vadd.f32 %v977_v52, %v947_v56  ;;  %v949_v4 = vmul.f32 %v1473_v44, %v1473_v44 }
  0xf8   :  { %v1035_v63 = vadd.f32 %v1514_v34, %v1034_v57  ;;  %v1103_v0 = vadd.f32 %v1102_v55, %v1072_v58 }
  0xf9   :  { %v1476_v1 = vpop.f32.mrb[8].mxu0  ;;  %v911_v3 = vadd.f32 %v1473_v44, %v910_v60  ;;  %v979_v5 = vadd.f32 %v978_v62, %v948_v59 }
  0xfa   :  { %v1518_v2 = vpop.f32.mrb[16].mxu1  ;;  %v1104_v6 = vadd.f32 %v1103_v0, %v1073_v51  ;;  %v292_v7 = vpop.f32.mrb[9].mxu0  ;;  %v1036_v11 = vadd.f32 %v1515_v45, %v1035_v63  ;;  %v952_v30 = vmul.f32 %v1476_v1, %v1476_v1 }
  0xfb   :  { %891 = vst [vmem:[#allocation4 + $0x90] sm:$0xff] %v1518_v2  ;;  %v650_v8 = vpop.f32.mrb[17].mxu1  ;;  %v912_v9 = vadd.f32 %v911_v3, %v292_v7  ;;  %v950_v10 = vmul.f32 %v292_v7, %v292_v7  ;;  %v1477_v13 = vpop.f32.mrb[10].mxu0  ;;  %v980_v15 = vadd.f32 %v979_v5, %v949_v4  ;;  %v1077_v20 = vmul.f32 %v1518_v2, %v1518_v2 }
  0xfc   :  { %889 = vst [vmem:[#allocation4 + $0x80] sm:$0xff] %v650_v8  ;;  %v1075_v12 = vmul.f32 %v650_v8, %v650_v8  ;;  %v1519_v14 = vpop.f32.mrb[18].mxu1  ;;  %v1105_v16 = vadd.f32 %v1104_v6, %v1074_v61  ;;  %v1351_v17 = vpack.c.bf16 %v1477_v13, %v1476_v1  ;;  %v295_v18 = vpop.f32.mrb[11].mxu0  ;;  %v1037_v21 = vadd.f32 %v1036_v11, %v650_v8 }
  0xfd   :  { %892 = vst [vmem:[#allocation4 + $0x98] sm:$0xff] %v1519_v14  ;;  %v653_v19 = vpop.f32.mrb[19].mxu1  ;;  %v1346_v22 = vpack.c.bf16 %v295_v18, %v292_v7  ;;  %v913_v23 = vadd.f32 %v912_v9, %v295_v18  ;;  %v981_v24 = vadd.f32 %v980_v15, %v950_v10  ;;  %v951_v26 = vmul.f32 %v295_v18, %v295_v18 }
  0xfe   :  { %890 = vst [vmem:[#allocation4 + $0x88] sm:$0xff] %v653_v19  ;;  %v1106_v25 = vadd.f32 %v1105_v16, %v1075_v12  ;;  %1407 = vst [vmem:[#allocation2 + $0x28] sm:$0xff] %v1351_v17   ;;  %v1076_v27 = vmul.f32 %v653_v19, %v653_v19  ;;  %v1038_v29 = vadd.f32 %v1037_v21, %v653_v19 }
  0xff   :  { %1406 = vst [vmem:[#allocation2 + $0x20] sm:$0xff] %v1346_v22   ;;  %v914_v28 = vadd.f32 %v1476_v1, %v913_v23  ;;  %v1078_v31 = vmul.f32 %v1519_v14, %v1519_v14  ;;  %v982_v32 = vadd.f32 %v981_v24, %v951_v26  ;;  %v953_v38 = vmul.f32 %v1477_v13, %v1477_v13 }
 0x100   :  { %v1107_v33 = vadd.f32 %v1106_v25, %v1076_v27  ;;  %v1039_v34 = vadd.f32 %v1518_v2, %v1038_v29 }
 0x101   :  { %v1480_v35 = vpop.f32.mrb[12].mxu0  ;;  %v915_v37 = vadd.f32 %v1477_v13, %v914_v28  ;;  %v983_v39 = vadd.f32 %v982_v32, %v952_v30 }
 0x102   :  { %v1522_v36 = vpop.f32.mrb[20].mxu1  ;;  %v1108_v40 = vadd.f32 %v1107_v33, %v1077_v20  ;;  %v308_v41 = vpop.f32.mrb[13].mxu0  ;;  %v1040_v45 = vadd.f32 %v1519_v14, %v1039_v34  ;;  %v956_v0 = vmul.f32 %v1480_v35, %v1480_v35 }
 0x103   :  { %895 = vst [vmem:[#allocation4 + $0xb0] sm:$0xff] %v1522_v36  ;;  %v666_v42 = vpop.f32.mrb[21].mxu1  ;;  %v916_v43 = vadd.f32 %v915_v37, %v308_v41  ;;  %v954_v44 = vmul.f32 %v308_v41, %v308_v41  ;;  %v1481_v47 = vpop.f32.mrb[14].mxu0  ;;  %v984_v49 = vadd.f32 %v983_v39, %v953_v38  ;;  %v1081_v54 = vmul.f32 %v1522_v36, %v1522_v36 }
 0x104   :  { %893 = vst [vmem:[#allocation4 + $0xa0] sm:$0xff] %v666_v42  ;;  %v1079_v46 = vmul.f32 %v666_v42, %v666_v42  ;;  %v1523_v48 = vpop.f32.mrb[22].mxu1  ;;  %v1109_v50 = vadd.f32 %v1108_v40, %v1078_v31  ;;  %v1361_v51 = vpack.c.bf16 %v1481_v47, %v1480_v35  ;;  %v311_v52 = vpop.f32.mrb[15].mxu0  ;;  %v1041_v55 = vadd.f32 %v1040_v45, %v666_v42 }
 0x105   :  { %896 = vst [vmem:[#allocation4 + $0xb8] sm:$0xff] %v1523_v48  ;;  %v669_v53 = vpop.f32.mrb[23].mxu1  ;;  %v1356_v56 = vpack.c.bf16 %v311_v52, %v308_v41  ;;  %v917_v57 = vadd.f32 %v916_v43, %v311_v52  ;;  %v985_v58 = vadd.f32 %v984_v49, %v954_v44  ;;  %v955_v60 = vmul.f32 %v311_v52, %v311_v52 }
 0x106   :  { %894 = vst [vmem:[#allocation4 + $0xa8] sm:$0xff] %v669_v53  ;;  %v1110_v59 = vadd.f32 %v1109_v50, %v1079_v46  ;;  %1409 = vst [vmem:[#allocation2 + $0x38] sm:$0xff] %v1361_v51   ;;  %v1080_v61 = vmul.f32 %v669_v53, %v669_v53  ;;  %v1042_v63 = vadd.f32 %v1041_v55, %v669_v53 }
 0x107   :  { %1408 = vst [vmem:[#allocation2 + $0x30] sm:$0xff] %v1356_v56   ;;  %v918_v62 = vadd.f32 %v1480_v35, %v917_v57  ;;  %v1082_v1 = vmul.f32 %v1523_v48, %v1523_v48  ;;  %v986_v2 = vadd.f32 %v985_v58, %v955_v60  ;;  %v957_v8 = vmul.f32 %v1481_v47, %v1481_v47 }
 0x108   :  { %v1111_v3 = vadd.f32 %v1110_v59, %v1080_v61  ;;  %v1043_v4 = vadd.f32 %v1522_v36, %v1042_v63 }
 0x109   :  { %v1484_v5 = vpop.f32.mrb[16].mxu0  ;;  %v919_v7 = vadd.f32 %v1481_v47, %v918_v62  ;;  %v987_v9 = vadd.f32 %v986_v2, %v956_v0 }
 0x10a   :  { %v1526_v6 = vpop.f32.mrb[24].mxu1  ;;  %v1112_v10 = vadd.f32 %v1111_v3, %v1081_v54  ;;  %v324_v11 = vpop.f32.mrb[17].mxu0  ;;  %v1044_v15 = vadd.f32 %v1523_v48, %v1043_v4  ;;  %v960_v34 = vmul.f32 %v1484_v5, %v1484_v5 }
 0x10b   :  { %899 = vst [vmem:[#allocation4 + $0xd0] sm:$0xff] %v1526_v6  ;;  %v682_v12 = vpop.f32.mrb[25].mxu1  ;;  %v920_v13 = vadd.f32 %v919_v7, %v324_v11  ;;  %v958_v14 = vmul.f32 %v324_v11, %v324_v11  ;;  %v1485_v17 = vpop.f32.mrb[18].mxu0  ;;  %v988_v19 = vadd.f32 %v987_v9, %v957_v8  ;;  %v1085_v24 = vmul.f32 %v1526_v6, %v1526_v6 }
 0x10c   :  { %897 = vst [vmem:[#allocation4 + $0xc0] sm:$0xff] %v682_v12  ;;  %v1083_v16 = vmul.f32 %v682_v12, %v682_v12  ;;  %v1527_v18 = vpop.f32.mrb[26].mxu1  ;;  %v1113_v20 = vadd.f32 %v1112_v10, %v1082_v1  ;;  %v1371_v21 = vpack.c.bf16 %v1485_v17, %v1484_v5  ;;  %v327_v22 = vpop.f32.mrb[19].mxu0  ;;  %v1045_v25 = vadd.f32 %v1044_v15, %v682_v12 }
 0x10d   :  { %900 = vst [vmem:[#allocation4 + $0xd8] sm:$0xff] %v1527_v18  ;;  %v685_v23 = vpop.f32.mrb[27].mxu1  ;;  %v1366_v26 = vpack.c.bf16 %v327_v22, %v324_v11  ;;  %v921_v27 = vadd.f32 %v920_v13, %v327_v22  ;;  %v989_v28 = vadd.f32 %v988_v19, %v958_v14  ;;  %v959_v30 = vmul.f32 %v327_v22, %v327_v22 }
 0x10e   :  { %898 = vst [vmem:[#allocation4 + $0xc8] sm:$0xff] %v685_v23  ;;  %v1114_v29 = vadd.f32 %v1113_v20, %v1083_v16  ;;  %1411 = vst [vmem:[#allocation2 + $0x48] sm:$0xff] %v1371_v21   ;;  %v1084_v31 = vmul.f32 %v685_v23, %v685_v23  ;;  %v1046_v33 = vadd.f32 %v1045_v25, %v685_v23 }
 0x10f   :  { %1410 = vst [vmem:[#allocation2 + $0x40] sm:$0xff] %v1366_v26   ;;  %v922_v32 = vadd.f32 %v1484_v5, %v921_v27  ;;  %v1086_v35 = vmul.f32 %v1527_v18, %v1527_v18  ;;  %v990_v36 = vadd.f32 %v989_v28, %v959_v30  ;;  %v961_v42 = vmul.f32 %v1485_v17, %v1485_v17 }
 0x110   :  { %v1115_v37 = vadd.f32 %v1114_v29, %v1084_v31  ;;  %v1047_v38 = vadd.f32 %v1526_v6, %v1046_v33 }
 0x111   :  { %v1488_v39 = vpop.f32.mrb[20].mxu0  ;;  %v923_v41 = vadd.f32 %v1485_v17, %v922_v32  ;;  %v991_v43 = vadd.f32 %v990_v36, %v960_v34 }
 0x112   :  { %v1530_v40 = vpop.f32.mrb[28].mxu1  ;;  %v1116_v44 = vadd.f32 %v1115_v37, %v1085_v24  ;;  %v340_v45 = vpop.f32.mrb[21].mxu0  ;;  %v1048_v49 = vadd.f32 %v1527_v18, %v1047_v38 }
 0x113   :  { %903 = vst [vmem:[#allocation4 + $0xf0] sm:$0xff] %v1530_v40  ;;  %v698_v46 = vpop.f32.mrb[29].mxu1  ;;  %v924_v47 = vadd.f32 %v923_v41, %v340_v45  ;;  %v962_v48 = vmul.f32 %v340_v45, %v340_v45  ;;  %v1489_v51 = vpop.f32.mrb[22].mxu0  ;;  %v992_v53 = vadd.f32 %v991_v43, %v961_v42  ;;  %v1089_v58 = vmul.f32 %v1530_v40, %v1530_v40 }
 0x114   :  { %901 = vst [vmem:[#allocation4 + $0xe0] sm:$0xff] %v698_v46  ;;  %v1087_v50 = vmul.f32 %v698_v46, %v698_v46  ;;  %v1531_v52 = vpop.f32.mrb[30].mxu1  ;;  %v1117_v54 = vadd.f32 %v1116_v44, %v1086_v35  ;;  %v1381_v55 = vpack.c.bf16 %v1489_v51, %v1488_v39  ;;  %v343_v56 = vpop.f32.mrb[23].mxu0  ;;  %v1049_v59 = vadd.f32 %v1048_v49, %v698_v46 }
 0x115   :  { %904 = vst [vmem:[#allocation4 + $0xf8] sm:$0xff] %v1531_v52  ;;  %v701_v57 = vpop.f32.mrb[31].mxu1  ;;  %v1376_v60 = vpack.c.bf16 %v343_v56, %v340_v45  ;;  %v925_v61 = vadd.f32 %v924_v47, %v343_v56  ;;  %v993_v62 = vadd.f32 %v992_v53, %v962_v48  ;;  %v963_v0 = vmul.f32 %v343_v56, %v343_v56 }
 0x116   :  { %902 = vst [vmem:[#allocation4 + $0xe8] sm:$0xff] %v701_v57  ;;  %v1118_v63 = vadd.f32 %v1117_v54, %v1087_v50  ;;  %1413 = vst [vmem:[#allocation2 + $0x58] sm:$0xff] %v1381_v55   ;;  %v1088_v1 = vmul.f32 %v701_v57, %v701_v57 }
 0x117   :  { %1590 = shalt.err (!%p1587_p4)
}
 0x118   :  { %s1591_s29 = scalar_lea.hbm %s1950_s5, 4096 }
 0x119   :  { %p1592_p5 = scmp.ne.s32.totalorder %s1950_s5, %s1591_s29  ;;  %p1595_p6 = scmp.lt.u32.totalorder %s1591_s29, %s1950_s5 }
 0x11b   :  { %p1597_p7 = pnand %p1595_p6, %p1592_p5 }
 0x11d   :  { %1600 = shalt.err (!%p1597_p7)
}
 0x11e   :  { %s1674_s9 = smov 128   ;;  %s1675_s10 = smov 8   ;;  %1412 = vst [vmem:[#allocation2 + $0x50] sm:$0xff] %v1376_v60   ;;  %v926_v2 = vadd.f32 %v1488_v39, %v925_v61  ;;  %v1050_v3 = vadd.f32 %v1049_v59, %v701_v57  ;;  %v964_v4 = vmul.f32 %v1488_v39, %v1488_v39  ;;  %v1090_v5 = vmul.f32 %v1531_v52, %v1531_v52  ;;  %v1492_v9 = vpop.f32.mrb[24].mxu0 }
 0x11f   :  { %1154 = dma.vmem_to_hbm [thread:$0]  %s1871_s25, 4096, %s1950_s5, [#allocation5], %s1674_s9, %s1674_s9, %s1675_s10   ;;  %v994_v6 = vadd.f32 %v993_v62, %v963_v0  ;;  %v1119_v7 = vadd.f32 %v1118_v63, %v1088_v1  ;;  %v965_v11 = vmul.f32 %v1489_v51, %v1489_v51  ;;  %v356_v14 = vpop.f32.mrb[25].mxu0  ;;  %v1011_v31 = vlaneseq }
 0x120   :  { %v1051_v8 = vadd.f32 %v1530_v40, %v1050_v3  ;;  %v927_v10 = vadd.f32 %v1489_v51, %v926_v2  ;;  %v966_v17 = vmul.f32 %v356_v14, %v356_v14  ;;  %v1493_v18 = vpop.f32.mrb[26].mxu0  ;;  %v968_v33 = vmul.f32 %v1492_v9, %v1492_v9  ;;  %s1676_s5 = smov [#allocation2]   ;;  %s1677_s14 = smov [#allocation7]  }
 0x121   :  { %v995_v12 = vadd.f32 %v994_v6, %v964_v4  ;;  %v1120_v13 = vadd.f32 %v1119_v7, %v1089_v58  ;;  %v1391_v21 = vpack.c.bf16 %v1493_v18, %v1492_v9  ;;  %v359_v22 = vpop.f32.mrb[27].mxu0  ;;  %v969_v38 = vmul.f32 %v1493_v18, %v1493_v18  ;;  %s1136_s13 = sshll.u32 %s1676_s5, 4  ;;  %s1171_s15 = sshll.u32 %s1677_s14, 4  ;;  %s1892_s13 = int_to_ptr.vmem [resolvable:$true] %s1136_s13  ;;  %s1172_s15 = int_to_ptr.vmem [resolvable:$true] %s1171_s15 }
 0x122   :  { %v1052_v15 = vadd.f32 %v1531_v52, %v1051_v8  ;;  %v928_v16 = vadd.f32 %v927_v10, %v356_v14  ;;  %v1386_v24 = vpack.c.bf16 %v359_v22, %v356_v14  ;;  %v967_v26 = vmul.f32 %v359_v22, %v359_v22  ;;  %v1496_v36 = vpop.f32.mrb[28].mxu0  ;;  %s1601_s16 = scalar_lea.vmem %s1892_s13, 2048  ;;  %p1606_p9 = scmp.lt.s32.totalorder %s1892_s13, %s1892_s13 }
 0x123   :  { %v1121_v19 = vadd.f32 %v1120_v13, %v1090_v5  ;;  %v996_v20 = vadd.f32 %v995_v12, %v965_v11  ;;  %1415 = vst [vmem:[#allocation2 + $0x68] sm:$0xff] %v1391_v21   ;;  %v372_v40 = vpop.f32.mrb[29].mxu0  ;;  %v1890_v45 = vshrl.u32 %v1011_v31, 7  ;;  %v972_v59 = vmul.f32 %v1496_v36, %v1496_v36  ;;  %p1602_p8 = scmp.ne.s32.totalorder %s1892_s13, %s1601_s16  ;;  %p1607_p10 = scmp.lt.s32.totalorder %s1601_s16, %s1601_s16 }
 0x124   :  { %v1053_v23 = vrot.slane %v1052_v15, 4  ;;  %v929_v25 = vadd.f32 %v928_v16, %v359_v22  ;;  %1414 = vst [vmem:[#allocation2 + $0x60] sm:$0xff] %v1386_v24   ;;  %v970_v43 = vmul.f32 %v372_v40, %v372_v40  ;;  %v1497_v44 = vpop.f32.mrb[30].mxu0 }
 0x125   :  { %v1122_v27 = vrot.slane %v1121_v19, 4  ;;  %v997_v28 = vadd.f32 %v996_v20, %v966_v17  ;;  %v1401_v48 = vpack.c.bf16 %v1497_v44, %v1496_v36  ;;  %v375_v49 = vpop.f32.mrb[31].mxu0  ;;  %vm1014_vm3 = vcmp.eq.s32.totalorder %v1890_v45, 1  ;;  %p1608_p11 = por %p1607_p10, %p1606_p9 }
 0x126   :  { %v1054_v29 = vadd.f32 %v1053_v23, %v1052_v15  ;;  %v930_v30 = vadd.f32 %v1492_v9, %v929_v25  ;;  %v1396_v51 = vpack.c.bf16 %v375_v49, %v372_v40  ;;  %v971_v53 = vmul.f32 %v375_v49, %v375_v49 }
 0x127   :  { %v1123_v32 = vadd.f32 %v1122_v27, %v1121_v19  ;;  %v998_v34 = vadd.f32 %v997_v28, %v967_v26  ;;  %1417 = vst [vmem:[#allocation2 + $0x78] sm:$0xff] %v1401_v48   ;;  %p1609_p12 = pnand %p1608_p11, %p1602_p8 }
 0x128   :  { %v1055_v35 = vrot.slane %v1054_v29, 2  ;;  %v931_v37 = vadd.f32 %v1493_v18, %v930_v30  ;;  %1416 = vst [vmem:[#allocation2 + $0x70] sm:$0xff] %v1396_v51  }
 0x129   :  { %v999_v39 = vadd.f32 %v998_v34, %v968_v33  ;;  %v1124_v41 = vrot.slane %v1123_v32, 2 }
 0x12a   :  { %v932_v42 = vadd.f32 %v931_v37, %v372_v40  ;;  %v1056_v46 = vadd.f32 %v1055_v35, %v1054_v29 }
 0x12b   :  { %v1000_v47 = vadd.f32 %v999_v39, %v969_v38  ;;  %v1125_v50 = vadd.f32 %v1124_v41, %v1123_v32 }
 0x12c   :  { %v933_v52 = vadd.f32 %v932_v42, %v375_v49  ;;  %v1057_v54 = vrot.slane %v1056_v46, 1 }
 0x12d   :  { %v1001_v55 = vadd.f32 %v1000_v47, %v970_v43  ;;  %v1126_v56 = vrot.slane %v1125_v50, 1 }
 0x12e   :  { %v934_v57 = vadd.f32 %v1496_v36, %v933_v52  ;;  %v1058_v58 = vadd.f32 %v1057_v54, %v1056_v46 }
 0x12f   :  { %v1002_v60 = vadd.f32 %v1001_v55, %v971_v53 }
 0x130   :  { %1612 = shalt.err (!%p1609_p12)
}
 0x131   :  { %s1613_s19 = scalar_lea.hbm %s1949_s4, 2048 }
 0x132   :  { %p1614_p13 = scmp.ne.s32.totalorder %s1949_s4, %s1613_s19  ;;  %p1617_p0 = scmp.lt.u32.totalorder %s1613_s19, %s1949_s4 }
 0x134   :  { %p1619_p1 = pnand %p1617_p0, %p1614_p13 }
 0x136   :  { %1622 = shalt.err (!%p1619_p1)
}
 0x137   :  { %s1678_s2 = smov 64   ;;  %s1679_s24 = smov 4   ;;  %vm1013_vm4 = vcmp.eq.s32.totalorder %v1890_v45, 0  ;;  %v1127_v61 = vadd.f32 %v1126_v56, %v1125_v50  ;;  %v935_v62 = vadd.f32 %v1497_v44, %v934_v57  ;;  %v973_v63 = vmul.f32 %v1497_v44, %v1497_v44 }
 0x138   :  { %1142 = dma.vmem_to_hbm [thread:$0]  %s1892_s13, 2048, %s1949_s4, [#allocation3], %s1678_s2, %s1678_s2, %s1679_s24   ;;  %v1003_v0 = vadd.f32 %v1002_v60, %v972_v59 }
 0x139   :  { %v1128_v1 = vsel %vm1014_vm3, %v1127_v61, 0.0  ;;  %v936_v2 = vrot.slane %v935_v62, 4  ;;  %s1623_s26 = scalar_lea.vmem %s1172_s15, 128  ;;  %p1628_p3 = scmp.lt.s32.totalorder %s1172_s15, %s1172_s15 }
 0x13a   :  { %v1129_v3 = vsel %vm1013_vm4, %v1058_v58, %v1128_v1  ;;  %v1004_v4 = vadd.f32 %v1003_v0, %v973_v63  ;;  %p1624_p2 = scmp.ne.s32.totalorder %s1172_s15, %s1623_s26  ;;  %p1629_p4 = scmp.lt.s32.totalorder %s1623_s26, %s1623_s26 }
 0x13b   :  { %1130 = vst [vmem:[#allocation7] sm:$0xff] %v1129_v3  ;;  %v937_v5 = vadd.f32 %v936_v2, %v935_v62 }
 0x13c   :  { %p1630_p5 = por %p1629_p4, %p1628_p3 }
 0x13e   :  { %p1631_p6 = pnand %p1630_p5, %p1624_p2 }
 0x140   :  { %1634 = shalt.err (!%p1631_p6)
}
 0x141   :  { %s1635_s28 = scalar_lea.hbm %s1952_s7, 128 }
 0x142   :  { %p1636_p7 = scmp.ne.s32.totalorder %s1952_s7, %s1635_s28  ;;  %p1639_p8 = scmp.lt.u32.totalorder %s1635_s28, %s1952_s7 }
 0x144   :  { %p1641_p9 = pnand %p1639_p8, %p1636_p7 }
 0x146   :  { %1644 = shalt.err (!%p1641_p9)
}
 0x147   :  { %1174 = dma.vmem_to_hbm [thread:$0]  %s1172_s15, 128, %s1952_s7, [#allocation8]   ;;  %v1005_v6 = vrot.slane %v1004_v4, 4  ;;  %v938_v7 = vrot.slane %v937_v5, 2 }
 0x148   :  { %s1680_s10 = smov [#allocation6]  }
 0x149   :  { %v1006_v8 = vadd.f32 %v1005_v6, %v1004_v4  ;;  %v939_v9 = vadd.f32 %v938_v7, %v937_v5  ;;  %s1161_s11 = sshll.u32 %s1680_s10, 4  ;;  %s1162_s11 = int_to_ptr.vmem [resolvable:$true] %s1161_s11 }
 0x14a   :  { %s1645_s7 = scalar_lea.vmem %s1162_s11, 128  ;;  %p1650_p11 = scmp.lt.s32.totalorder %s1162_s11, %s1162_s11 }
 0x14b   :  { %v1007_v10 = vrot.slane %v1006_v8, 2  ;;  %v940_v12 = vrot.slane %v939_v9, 1  ;;  %p1646_p10 = scmp.ne.s32.totalorder %s1162_s11, %s1645_s7  ;;  %p1651_p12 = scmp.lt.s32.totalorder %s1645_s7, %s1645_s7 }
 0x14d   :  { %v1008_v11 = vadd.f32 %v1007_v10, %v1006_v8  ;;  %v941_v15 = vadd.f32 %v940_v12, %v939_v9  ;;  %p1652_p13 = por %p1651_p12, %p1650_p11 }
 0x14f   :  { %v1009_v13 = vrot.slane %v1008_v11, 1  ;;  %p1653_p0 = pnand %p1652_p13, %p1646_p10 }
 0x151   :  { %v1010_v14 = vadd.f32 %v1009_v13, %v1008_v11 }
 0x153   :  { %v1017_v16 = vsel %vm1014_vm3, %v1010_v14, 0.0 }
 0x154   :  { %v1020_v17 = vsel %vm1013_vm4, %v941_v15, %v1017_v16 }
 0x155   :  { %1021 = vst [vmem:[#allocation6] sm:$0xff] %v1020_v17 }
 0x156   :  { %1656 = shalt.err (!%p1653_p0)
}
 0x157   :  { %s1657_s13 = scalar_lea.hbm %s1951_s6, 128 }
 0x158   :  { %p1658_p1 = scmp.ne.s32.totalorder %s1951_s6, %s1657_s13  ;;  %p1661_p2 = scmp.lt.u32.totalorder %s1657_s13, %s1951_s6 }
 0x15a   :  { %p1663_p3 = pnand %p1661_p2, %p1658_p1 }
 0x15c   :  { %1666 = shalt.err (!%p1663_p3)
}
 0x15d   :  { %1164 = dma.vmem_to_hbm [thread:$0]  %s1162_s11, 128, %s1951_s6, [#allocation5]  }
 0x15e   :  { %1667 = dma.done.wait [#allocation3], 2048  }
 0x15f   :  { %1668 = vsyncadd [#allocation3], 4294965248 }
 0x160   :  { %1669 = dma.done.wait [#allocation5], 4224  }
 0x161   :  { %1670 = vsyncadd [#allocation5], 4294963072 }
 0x162   :  { %1671 = dma.done.wait [#allocation8], 128  }
 0x163   :  { %1672 = vsyncadd [#allocation8], 4294967168 }
 0x164   :  { %1187 = vsyncpa [#allocation3], 1 }
 0x165   :  { %1188 = vsyncpa [#allocation5], 1 }
 0x166   :  { %1189 = vsyncpa [#allocation8], 1 }

</bundles_post_ra>
